<compile_context>
chip_gen: v7x
topology: tpu7x:2x2x1
jax: 0.10.0
libtpu: 0.0.40
codegen_flags: <defaults>
</compile_context>

<pallas_src>
import functools

import jax
import jax.numpy as jnp
from jax.experimental import pallas as pl
from jax.experimental.pallas import tpu as pltpu


def _mlp_kernel(x_ref, w1_ref, b1_ref, w2_ref, b2_ref, o_ref):
    # x:  [din, bt]   activations, batch on lanes
    # w1: [hid, din]  fc1 weight (PyTorch nn.Linear [out, in] layout)
    # b1: [hid, 1]
    # w2: [hid, dout] fc2 weight, transposed once in the wrapper
    # b2: [dout, 1]
    # o:  [dout, bt]
    x = x_ref[...]
    w1 = w1_ref[...]
    w2 = w2_ref[...]
    b2 = b2_ref[...]
    din = x.shape[0]
    hid = w1.shape[0]
    bt = x.shape[1]
    dout = o_ref.shape[0]

    # fc1 + bias: `din` broadcast-FMAs on the VPU (static unroll, din == 2).
    # x[k:k+1, :] broadcasts over sublanes; w1[:, k:k+1] broadcasts over lanes.
    h = jnp.broadcast_to(b1_ref[...], (hid, bt))
    for k in range(din):
        h = h + w1[:, k:k + 1] * x[k:k + 1, :]
    h = jnp.maximum(h, 0.0)                       # ReLU

    # fc2 + bias: elementwise multiply + sublane (XLU) reduction per out row.
    rows = []
    for j in range(dout):                         # static unroll, dout == 1
        r = jnp.sum(h * w2[:, j:j + 1], axis=0, keepdims=True)
        rows.append(r + b2[j:j + 1, :])
    o = rows[0] if dout == 1 else jnp.concatenate(rows, axis=0)
    o_ref[...] = o.astype(o_ref.dtype)


@functools.partial(jax.jit, static_argnames=("batch_tile", "core_parallel"))
def ghwnet_forward(x, w1, b1, w2, b2, *, batch_tile: int = 65536,
                   core_parallel: bool = False):
    """Fused GHWNet forward.

    x : [N, input_dim] float32
    w1: [hidden, input_dim]   (PyTorch nn.Linear layout)
    b1: [hidden]
    w2: [output_dim, hidden]
    b2: [output_dim]
    returns [N, output_dim]
    """
    n, din = x.shape
    hid = w1.shape[0]
    dout = w2.shape[0]

    # Lane-dim (batch) tile: multiple of 128 when tiling, or full extent when
    # the whole batch fits one block (block dim == array dim is always legal).
    if n <= batch_tile:
        bt = n
    else:
        bt = max(128, (batch_tile // 128) * 128)
    grid = (pl.cdiv(n, bt),)

    # One-off layout plumbing (no padding, no output slice).
    x_t = x.T                        # [din, n]  batch on lanes
    b1_c = b1.reshape(hid, 1)
    w2_t = w2.T                      # [hid, dout]
    b2_c = b2.reshape(dout, 1)

    flops = 2 * n * (din * hid + hid * dout)
    bytes_accessed = 4 * (n * din + n * dout
                          + hid * din + hid + hid * dout + dout)

    dims = (pltpu.CORE_PARALLEL,) if core_parallel else ("parallel",)

    out_t = pl.pallas_call(
        _mlp_kernel,
        out_shape=jax.ShapeDtypeStruct((dout, n), x.dtype),
        grid_spec=pltpu.PrefetchScalarGridSpec(
            num_scalar_prefetch=0,
            grid=grid,
            in_specs=[
                # x streams over the batch (lane) grid axis.
                pl.BlockSpec((din, bt), lambda i: (0, i)),
                # Weights/biases: grid-invariant -> resident, no per-step DMA.
                pl.BlockSpec((hid, din), lambda i: (0, 0)),
                pl.BlockSpec((hid, 1), lambda i: (0, 0)),
                pl.BlockSpec((hid, dout), lambda i: (0, 0)),
                pl.BlockSpec((dout, 1), lambda i: (0, 0)),
            ],
            out_specs=pl.BlockSpec((dout, bt), lambda i: (0, i)),
        ),
        compiler_params=pltpu.CompilerParams(
            dimension_semantics=dims,
            vmem_limit_bytes=48 * 1024 * 1024),
        cost_estimate=pl.CostEstimate(
            flops=flops, transcendentals=0, bytes_accessed=bytes_accessed),
    )(x_t, w1, b1_c, w2_t, b2_c)

    return out_t.T                   # [n, dout]


def init_params(key, input_dim: int = 2, hidden_dim: int = 16,
                output_dim: int = 1):
    """Deterministic PyTorch-style init (uniform +/- 1/sqrt(fan_in)),
    weights in PyTorch nn.Linear [out, in] layout."""
    k1, k2, k3, k4 = jax.random.split(key, 4)
    bound1 = 1.0 / (input_dim ** 0.5)
    bound2 = 1.0 / (hidden_dim ** 0.5)
    w1 = jax.random.uniform(k1, (hidden_dim, input_dim), jnp.float32,
                            -bound1, bound1)
    b1 = jax.random.uniform(k2, (hidden_dim,), jnp.float32, -bound1, bound1)
    w2 = jax.random.uniform(k3, (output_dim, hidden_dim), jnp.float32,
                            -bound2, bound2)
    b2 = jax.random.uniform(k4, (output_dim,), jnp.float32, -bound2, bound2)
    return w1, b1, w2, b2


def _reference(x, w1, b1, w2, b2):
    return jnp.maximum(x @ w1.T + b1, 0.0) @ w2.T + b2


if __name__ == "__main__":
    key = jax.random.PRNGKey(0)
    k_x, k_x2, k_p = jax.random.split(key, 3)

    input_dim, hidden_dim, output_dim = 2, 16, 1
    w1, b1, w2, b2 = init_params(k_p, input_dim, hidden_dim, output_dim)

    # Small batch (module-sized demo): single full-extent block.
    x_small = jax.random.normal(k_x, (8, input_dim), jnp.float32)
    out_small = jax.block_until_ready(ghwnet_forward(x_small, w1, b1, w2, b2))
    ref_small = _reference(x_small, w1, b1, w2, b2)
    assert out_small.shape == (8, output_dim)
    assert jnp.allclose(out_small, ref_small, atol=1e-5, rtol=1e-5)

    # Larger batch with a small tile: exercises multi-step streaming grid and
    # the ragged (partial) last block -- no wrapper pad, no output slice.
    x_big = jax.random.normal(k_x2, (1000, input_dim), jnp.float32)
    out_big = jax.block_until_ready(
        ghwnet_forward(x_big, w1, b1, w2, b2, batch_tile=256))
    ref_big = _reference(x_big, w1, b1, w2, b2)
    assert out_big.shape == (1000, output_dim)
    assert jnp.allclose(out_big, ref_big, atol=1e-5, rtol=1e-5)

    print("KERNEL_OK")
</pallas_src>

<mosaic_0001>
module attributes {stable_mosaic.version = 11 : i64} {
  func.func @_mlp_kernel(%arg0: i32, %arg1: memref<2x8xf32, #tpu.memory_space<vmem>>, %arg2: memref<16x2xf32, #tpu.memory_space<vmem>>, %arg3: memref<16x1xf32, #tpu.memory_space<vmem>>, %arg4: memref<16x1xf32, #tpu.memory_space<vmem>>, %arg5: memref<1x1xf32, #tpu.memory_space<vmem>>, %arg6: memref<1x8xf32, #tpu.memory_space<vmem>>) attributes {dimension_semantics = [#tpu.dimension_semantics<parallel>], iteration_bounds = array<i64: 1>, scalar_prefetch = 0 : i64, scratch_operands = 0 : i64, tpu.core_type = #tpu.core_type<tc>, window_params = [{transform_indices = @transform_0, window_bounds = array<i64: 2, 8>}, {pipeline_mode = #tpu.pipeline_mode<synchronous>, transform_indices = @transform_1, window_bounds = array<i64: 16, 2>}, {pipeline_mode = #tpu.pipeline_mode<synchronous>, transform_indices = @transform_2, window_bounds = array<i64: 16, 1>}, {pipeline_mode = #tpu.pipeline_mode<synchronous>, transform_indices = @transform_3, window_bounds = array<i64: 16, 1>}, {pipeline_mode = #tpu.pipeline_mode<synchronous>, transform_indices = @transform_4, window_bounds = array<i64: 1, 1>}, {transform_indices = @transform_5, window_bounds = array<i64: 1, 8>}]} {
    %c0 = arith.constant 0 : index
    %c0_0 = arith.constant 0 : index
    %0 = vector.load %arg1[%c0, %c0_0] : memref<2x8xf32, #tpu.memory_space<vmem>>, vector<2x8xf32>
    %c0_1 = arith.constant 0 : index
    %c0_2 = arith.constant 0 : index
    %1 = vector.load %arg2[%c0_1, %c0_2] : memref<16x2xf32, #tpu.memory_space<vmem>>, vector<16x2xf32>
    %c0_3 = arith.constant 0 : index
    %c0_4 = arith.constant 0 : index
    %2 = vector.load %arg4[%c0_3, %c0_4] : memref<16x1xf32, #tpu.memory_space<vmem>>, vector<16x1xf32>
    %c0_5 = arith.constant 0 : index
    %c0_6 = arith.constant 0 : index
    %3 = vector.load %arg5[%c0_5, %c0_6] : memref<1x1xf32, #tpu.memory_space<vmem>>, vector<1x1xf32>
    %c0_7 = arith.constant 0 : index
    %c0_8 = arith.constant 0 : index
    %4 = vector.load %arg3[%c0_7, %c0_8] : memref<16x1xf32, #tpu.memory_space<vmem>>, vector<16x1xf32>
    %5 = vector.shape_cast %4 : vector<16x1xf32> to vector<16x1xf32>
    %6 = vector.broadcast %5 : vector<16x1xf32> to vector<16x8xf32>
    %7 = vector.extract_strided_slice %1 {offsets = [0, 0], sizes = [16, 1], strides = [1, 1]} : vector<16x2xf32> to vector<16x1xf32>
    %8 = vector.extract_strided_slice %0 {offsets = [0, 0], sizes = [1, 8], strides = [1, 1]} : vector<2x8xf32> to vector<1x8xf32>
    %9 = vector.broadcast %7 : vector<16x1xf32> to vector<16x8xf32>
    %10 = vector.broadcast %8 : vector<1x8xf32> to vector<16x8xf32>
    %11 = arith.mulf %9, %10 : vector<16x8xf32>
    %12 = arith.addf %6, %11 : vector<16x8xf32>
    %13 = vector.extract_strided_slice %1 {offsets = [0, 1], sizes = [16, 1], strides = [1, 1]} : vector<16x2xf32> to vector<16x1xf32>
    %14 = vector.extract_strided_slice %0 {offsets = [1, 0], sizes = [1, 8], strides = [1, 1]} : vector<2x8xf32> to vector<1x8xf32>
    %15 = vector.broadcast %13 : vector<16x1xf32> to vector<16x8xf32>
    %16 = vector.broadcast %14 : vector<1x8xf32> to vector<16x8xf32>
    %17 = arith.mulf %15, %16 : vector<16x8xf32>
    %18 = arith.addf %12, %17 : vector<16x8xf32>
    %cst = arith.constant 0.000000e+00 : f32
    %19 = vector.broadcast %cst : f32 to vector<16x8xf32>
    %20 = arith.maximumf %18, %19 : vector<16x8xf32>
    %21 = vector.broadcast %2 : vector<16x1xf32> to vector<16x8xf32>
    %22 = arith.mulf %20, %21 : vector<16x8xf32>
    %cst_9 = arith.constant dense<0.000000e+00> : vector<8xf32>
    %23 = vector.multi_reduction <add>, %22, %cst_9 [0] : vector<16x8xf32> to vector<8xf32>
    %24 = vector.shape_cast %23 : vector<8xf32> to vector<1x8xf32>
    %25 = vector.broadcast %3 : vector<1x1xf32> to vector<1x8xf32>
    %26 = arith.addf %24, %25 : vector<1x8xf32>
    %c0_10 = arith.constant 0 : index
    %c0_11 = arith.constant 0 : index
    %27 = vector.load %arg6[%c0_10, %c0_11] : memref<1x8xf32, #tpu.memory_space<vmem>>, vector<1x8xf32>
    tpu.vector_store %arg6[%c0_10, %c0_11], %26 {strides = array<i32>} : memref<1x8xf32, #tpu.memory_space<vmem>>, vector<1x8xf32>,
    return
  }
  func.func @transform_0(%arg0: i32) -> (i32, i32) {
    %c0_i32 = arith.constant 0 : i32
    %c0_i32_0 = arith.constant 0 : i32
    return %c0_i32, %arg0 : i32, i32
  }
  func.func @transform_1(%arg0: i32) -> (i32, i32) {
    %c0_i32 = arith.constant 0 : i32
    %c0_i32_0 = arith.constant 0 : i32
    %c0_i32_1 = arith.constant 0 : i32
    return %c0_i32, %c0_i32_0 : i32, i32
  }
  func.func @transform_2(%arg0: i32) -> (i32, i32) {
    %c0_i32 = arith.constant 0 : i32
    %c0_i32_0 = arith.constant 0 : i32
    %c0_i32_1 = arith.constant 0 : i32
    return %c0_i32, %c0_i32_0 : i32, i32
  }
  func.func @transform_3(%arg0: i32) -> (i32, i32) {
    %c0_i32 = arith.constant 0 : i32
    %c0_i32_0 = arith.constant 0 : i32
    %c0_i32_1 = arith.constant 0 : i32
    return %c0_i32, %c0_i32_0 : i32, i32
  }
  func.func @transform_4(%arg0: i32) -> (i32, i32) {
    %c0_i32 = arith.constant 0 : i32
    %c0_i32_0 = arith.constant 0 : i32
    %c0_i32_1 = arith.constant 0 : i32
    return %c0_i32, %c0_i32_0 : i32, i32
  }
  func.func @transform_5(%arg0: i32) -> (i32, i32) {
    %c0_i32 = arith.constant 0 : i32
    %c0_i32_0 = arith.constant 0 : i32
    return %c0_i32, %arg0 : i32, i32
  }
}

</mosaic_0001>

<bundles_post_ra>
// kernel: ghwnet_forward.1
= control target key start
LH: loop header
LB: loop body
LE: loop exit
PB: predicated region body
PF: predicated region fallthrough
CT: control target
= control target key end

     0   :  { %s227_s0 = inlined_call_operand.vmem [shape: f32[2,8], index: 0, kind: input, shape index: {}]   ;;  %s228_s1 = inlined_call_operand.vmem [shape: f32[16,2], index: 1, kind: input, shape index: {}]   ;;  %s229_s2 = inlined_call_operand.vmem [shape: f32[16,1], index: 2, kind: input, shape index: {}]   ;;  %s230_s3 = inlined_call_operand.vmem [shape: f32[16,1], index: 3, kind: input, shape index: {}]   ;;  %s231_s4 = inlined_call_operand.<no memory space> [shape: f32[1,1], index: 4, kind: input, shape index: {}]   ;;  %s232_s5 = inlined_call_operand.hbm [shape: f32[1,8], index: 5, kind: output, shape index: {}]  }
   0x1   :  { %v10_v0 = vstv %s231_s4 }
   0x2   :  { %11 = vst [vmem:[#allocation2] sm:$0x1] %v10_v0 }
   0x3   :  { %v29_v1 = vld [vmem:[%s229_s2] sm:$0xff]  ;;  %v158_v3 = vmov 0   ;;  %v30_v4 = vld [vmem:[%s229_s2 + $0x8] sm:$0xff] }
   0x4   :  { %v24_v2 = vld [vmem:[%s228_s1] sm:$0xff]  ;;  %129 = vset.pattern.permute.xlu1 %v158_v3  ;;  %128 = vset.pattern.permute.xlu0 %v158_v3  ;;  %v25_v5 = vld [vmem:[%s228_s1 + $0x8] sm:$0xff] }
   0x5   :  { %33 = vperm.xlu1 %129, %v29_v1   ;;  %43 = vperm.xlu0 %128, %v24_v2  }
   0x6   :  { %12 = vsyncpa [#allocation4], 0  ;;  %v159_v6 = vmov 1   ;;  %v26_v7 = vld [vmem:[%s230_s3] sm:$0xff]  ;;  %v27_v8 = vld [vmem:[%s230_s3 + $0x8] sm:$0xff]  ;;  %v51_v10 = vlaneseq  ;;  %vm89_vm0 = vcmask 64512  }
   0x7   :  { %v23_v13 = vld [vmem:[%s227_s0] sm:$0x3]  ;;  %s160_s0 = smov [#allocation3]   ;;  %vm109_vm1 = vcmask 57344  }
   0x8   :  { %v52_v11 = vshrl.u32 %v51_v10, 7  ;;  %s117_s3 = sshll.u32 %s160_s0, 4  ;;  %s118_s3 = int_to_ptr.vmem [resolvable:$true] %s117_s3 }
   0x9   :  { %38 = vperm.xlu1 %129, %v30_v4   ;;  %48 = vperm.xlu0 %128, %v25_v5   ;;  %v28_v9 = vld [vmem:[#allocation2] sm:$0x1]  ;;  %s134_s6 = scalar_lea.vmem %s118_s3, 16  ;;  %s138_s7 = scalar_lea.vmem %s118_s3, 32 }
   0xa   :  { %v53_v12 = vsub.s32 0, %v52_v11  ;;  %v69_v17 = vsub.s32 1, %v52_v11  ;;  %p135_p0 = scmp.ne.s32.totalorder %s118_s3, %s134_s6  ;;  %p139_p1 = scmp.lt.s32.totalorder %s118_s3, %s118_s3 }
   0xb   :  { %p140_p2 = scmp.lt.s32.totalorder %s138_s7, %s134_s6 }
   0xc   :  { %v54_v16 = vrot.slane %v23_v13, %v53_v12  ;;  %v70_v22 = vrot.slane %v23_v13, %v69_v17 }
   0xd   :  { %131 = vset.pattern.permute.xlu1 %v159_v6  ;;  %130 = vset.pattern.permute.xlu0 %v159_v6  ;;  %p141_p3 = por %p140_p2, %p139_p1 }
   0xe   :  { %64 = vperm.xlu1 %131, %v25_v5   ;;  %60 = vperm.xlu0 %130, %v24_v2  }
   0xf   :  { %p142_p4 = pnand %p141_p3, %p135_p0 }
  0x12   :  { %132 = vset.pattern.permute.xlu1 %v158_v3  ;;  %133 = vset.pattern.permute.xlu0 %v158_v3 }
  0x13   :  { %79 = vperm.xlu1 %132, %v26_v7   ;;  %84 = vperm.xlu0 %133, %v27_v8  }
  0x17   :  { %101 = vperm.xlu1 %132, %v28_v9  }
  0x84   :  { %v34_v14 = vpop.permute.xlu1 %33  ;;  %v44_v15 = vpop.permute.xlu0 %43 }
  0x85   :  { %v55_v20 = vmul.f32 %v54_v16, %v44_v15 }
  0x87   :  { %v57_v25 = vadd.f32 %v55_v20, %v34_v14 }
  0x88   :  { %v39_v18 = vpop.permute.xlu1 %38  ;;  %v49_v19 = vpop.permute.xlu0 %48 }
  0x89   :  { %v56_v21 = vmul.f32 %v54_v16, %v49_v19 }
  0x8b   :  { %v58_v26 = vadd.f32 %v56_v21, %v39_v18 }
  0x8d   :  { %v65_v23 = vpop.permute.xlu1 %64  ;;  %v61_v24 = vpop.permute.xlu0 %60 }
  0x8e   :  { %v72_v27 = vmul.f32 %v70_v22, %v65_v23  ;;  %v71_v28 = vmul.f32 %v70_v22, %v61_v24 }
  0x90   :  { %v74_v29 = vadd.f32 %v72_v27, %v58_v26  ;;  %v73_v30 = vadd.f32 %v71_v28, %v57_v25 }
  0x92   :  { %v80_v31 = vpop.permute.xlu1 %79  ;;  %v75_v32 = vmax.f32 %v73_v30, 0.0  ;;  %v85_v33 = vpop.permute.xlu0 %84  ;;  %v76_v34 = vmax.f32 %v74_v29, 0.0 }
  0x94   :  { %v87_v35 = vmul.f32 %v80_v31, %v75_v32  ;;  %v88_v36 = vmul.f32 %v85_v33, %v76_v34 }
  0x96   :  { %v90_v37 = vsel %vm89_vm0, %v87_v35, 0.0  ;;  %v91_v38 = vsel %vm89_vm0, %v88_v36, 0.0  ;;  %v102_v44 = vpop.permute.xlu1 %101 }
  0x97   :  { %v92_v39 = vadd.f32 %v91_v38, %v90_v37  ;;  %v107_v47 = vrot.slane %v102_v44, %v53_v12 }
  0x99   :  { %v93_v40 = vrot.slane %v92_v39, 4 }
  0x9b   :  { %v94_v41 = vadd.f32 %v93_v40, %v92_v39 }
  0x9d   :  { %v95_v42 = vrot.slane %v94_v41, 2 }
  0x9f   :  { %v96_v43 = vadd.f32 %v95_v42, %v94_v41 }
  0xa1   :  { %v97_v45 = vrot.slane %v96_v43, 1 }
  0xa3   :  { %v98_v46 = vadd.f32 %v97_v45, %v96_v43 }
  0xa5   :  { %v108_v48 = vadd.f32 %v107_v47, %v98_v46 }
  0xa7   :  { %110 = vst.msk [vmem:[#allocation3] sm:$0x1] %vm109_vm1, %v108_v48 }
  0xa8   :  { %145 = shalt.err (!%p142_p4)
}
  0xa9   :  { %s146_s10 = scalar_lea.hbm %s232_s5, 16 }
  0xaa   :  { %p147_p5 = scmp.ne.s32.totalorder %s232_s5, %s146_s10  ;;  %p150_p6 = scmp.lt.u32.totalorder %s146_s10, %s232_s5 }
  0xac   :  { %p152_p7 = pnand %p150_p6, %p147_p5 }
  0xae   :  { %155 = shalt.err (!%p152_p7)
}
  0xaf   :  { %120 = dma.vmem_to_hbm [thread:$0]  %s118_s3, 16, %s232_s5, [#allocation4]  }
  0xb0   :  { %156 = dma.done.wait [#allocation4], 16  }
  0xb1   :  { %157 = vsyncadd [#allocation4], 4294967280 }
  0xb2   :  { %124 = vsyncpa [#allocation4], 1 }

</bundles_post_ra>
